<compile_context>
chip_gen: v6e
topology: v6e:2x2x1
jax: 0.10.0
libtpu: 0.0.40
codegen_flags: <defaults>
</compile_context>

<pallas_src>
import functools
import math

import jax
import jax.numpy as jnp
import numpy as np
from jax.experimental import pallas as pl
from jax.experimental.pallas import tpu as pltpu

# freq='h', embed_type='fixed': x_mark feature order is (month, day, weekday, hour)
VOCAB_SIZES = (13, 32, 7, 24)
V_PAD = 128  # pad the concatenated-table contraction dim to one MXU tile


def _sinusoidal_table(n_rows: int, d_model: int) -> jnp.ndarray:
    """Frozen sin/cos table (same formula as FixedEmbedding / PositionalEmbedding)."""
    position = jnp.arange(n_rows, dtype=jnp.float32)[:, None]
    div_term = jnp.exp(jnp.arange(0, d_model, 2, dtype=jnp.float32)
                       * -(math.log(10000.0) / d_model))
    tab = jnp.zeros((n_rows, d_model), dtype=jnp.float32)
    tab = tab.at[:, 0::2].set(jnp.sin(position * div_term))
    tab = tab.at[:, 1::2].set(jnp.cos(position * div_term))
    return tab


def _pick_tile_s(s: int) -> int:
    # Largest power-of-two divisor of S; per-tile VMEM footprint at 1024 rows is
    # ~2.3 MiB double-buffered -> well inside the scoped budget on v5e/v6e/v7x,
    # while keeping per-step overhead (~0.35 us) negligible.
    for t in (1024, 512, 256, 128, 64, 32, 16, 8):
        if s % t == 0:
            return t
    return s


def _data_embedding_kernel(xcat_ref, mark_ref, pe_ref, wcat_ref, tab_ref, out_ref,
                           *, offsets):
    # Value embedding: circular k=3 conv expressed as an im2col matmul (MXU).
    conv = jnp.dot(xcat_ref[...], wcat_ref[...],
                   preferred_element_type=jnp.float32)            # (TILE_S, d_model)

    # Temporal embedding: the sum of 4 table lookups == a single
    # multi-hot (TILE_S, V_PAD) @ resident table (V_PAD, d_model) matmul.
    marks = mark_ref[...]                                         # (TILE_S, n_feat) int32
    t = marks.shape[0]
    v = tab_ref.shape[0]
    lanes = jax.lax.broadcasted_iota(jnp.int32, (t, v), 1)
    hot_i = jnp.zeros((t, v), dtype=jnp.int32)
    for k, off in enumerate(offsets):                             # static 4-way unroll
        hot_i = hot_i + (lanes == (marks[:, k:k + 1] + off)).astype(jnp.int32)
    multi_hot = hot_i.astype(jnp.float32)                         # vocab ranges disjoint
    temporal = jnp.dot(multi_hot, tab_ref[...],
                       preferred_element_type=jnp.float32)        # (TILE_S, d_model)

    # Positional embedding add; dropout is identity in eval mode.
    # TODO(synk): train-mode nn.Dropout(p=0.1) omitted (would use pltpu.prng_seed +
    #             pltpu.stateful_bernoulli on the output tile).
    out_ref[...] = (conv + temporal + pe_ref[...]).astype(out_ref.dtype)


def data_embedding(x: jnp.ndarray, x_mark: jnp.ndarray, w_conv: jnp.ndarray) -> jnp.ndarray:
    """Fused DataEmbedding forward.
    x: (B, S, c_in) f32, x_mark: (B, S, 4) int, w_conv: (d_model, c_in, 3) f32."""
    B, S, c_in = x.shape
    d_model = w_conv.shape[0]
    n_feat = len(VOCAB_SIZES)
    assert w_conv.shape == (d_model, c_in, 3)
    assert x_mark.shape == (B, S, n_feat)

    # ---- host-side layout plumbing only (no compute hoisted out of the kernel) ----
    # im2col for the circular kernel: x_cat[b, s] = [x[b,(s-1)%S], x[b,s], x[b,(s+1)%S]]
    x_cat = jnp.concatenate(
        [jnp.roll(x, 1, axis=1), x, jnp.roll(x, -1, axis=1)], axis=-1)      # (B, S, 3*c_in)
    # matching weight layout: w_cat[k*c_in + c, d] = w_conv[d, c, k]
    w_cat = jnp.transpose(w_conv, (2, 1, 0)).reshape(3 * c_in, d_model)
    # pad contraction to a multiple of 8 sublanes (zero rows/cols -> exact)
    k_dim = 3 * c_in
    k_extra = (-k_dim) % 8
    if k_extra:
        x_cat = jnp.pad(x_cat, ((0, 0), (0, 0), (0, k_extra)))
        w_cat = jnp.pad(w_cat, ((0, k_extra), (0, 0)))
    k_tot = k_dim + k_extra

    # frozen tables: month | day | weekday | hour, concatenated + zero-padded to 128 rows
    table = jnp.concatenate([_sinusoidal_table(nr, d_model) for nr in VOCAB_SIZES], axis=0)
    total_vocab = table.shape[0]
    assert total_vocab <= V_PAD
    table = jnp.pad(table, ((0, V_PAD - total_vocab), (0, 0)))

    offsets, acc = [], 0
    for nr in VOCAB_SIZES:
        offsets.append(acc)
        acc += nr
    offsets = tuple(offsets)                                                 # (0, 13, 45, 52)

    pe = _sinusoidal_table(S, d_model)                                       # (S, d_model)
    marks = x_mark.astype(jnp.int32)

    tile_s = _pick_tile_s(S)
    # Sequence-tile axis OUTER, batch INNER: the PE block index is constant across the
    # inner axis, so each PE tile is DMA'd once instead of B times.
    grid = (S // tile_s, B)

    kernel = functools.partial(_data_embedding_kernel, offsets=offsets)

    out = pl.pallas_call(
        kernel,
        out_shape=jax.ShapeDtypeStruct((B, S, d_model), jnp.float32),
        grid_spec=pltpu.PrefetchScalarGridSpec(
            num_scalar_prefetch=0,
            grid=grid,
            in_specs=[
                # per-tile streaming inputs
                pl.BlockSpec((None, tile_s, k_tot), lambda si, b: (b, si, 0)),
                pl.BlockSpec((None, tile_s, n_feat), lambda si, b: (b, si, 0)),
                pl.BlockSpec((tile_s, d_model), lambda si, b: (si, 0)),
                # VMEM-resident parameters (constant block index => fetched once)
                pl.BlockSpec((k_tot, d_model), lambda si, b: (0, 0)),
                pl.BlockSpec((V_PAD, d_model), lambda si, b: (0, 0)),
            ],
            out_specs=pl.BlockSpec((None, tile_s, d_model), lambda si, b: (b, si, 0)),
        ),
        compiler_params=pltpu.CompilerParams(
            # disjoint output tiles -> both axes parallel (v7x dual-TC sharding)
            dimension_semantics=("parallel", "parallel"),
        ),
    )(x_cat, marks, pe, w_cat, table)
    return out


if __name__ == "__main__":
    # Small but lane-dense shapes: d_model = 128 keeps every output store using the
    # full 128-lane width.
    B, S, c_in, d_model = 2, 8, 4, 128

    key = jax.random.PRNGKey(0)
    kx, km, kw = jax.random.split(key, 3)

    x = jax.random.normal(kx, (B, S, c_in), dtype=jnp.float32)

    km0, km1, km2, km3 = jax.random.split(km, 4)
    x_mark = jnp.concatenate([
        jax.random.randint(km0, (B, S, 1), 0, 13, dtype=jnp.int32),   # month
        jax.random.randint(km1, (B, S, 1), 0, 32, dtype=jnp.int32),   # day
        jax.random.randint(km2, (B, S, 1), 0, 7, dtype=jnp.int32),    # weekday
        jax.random.randint(km3, (B, S, 1), 0, 24, dtype=jnp.int32),   # hour
    ], axis=-1)

    # TokenEmbedding conv weight (kaiming_normal_, fan_in, leaky_relu).
    fan_in = c_in * 3
    gain = math.sqrt(2.0 / (1.0 + 0.01 ** 2))
    w_conv = (gain / math.sqrt(fan_in)) * jax.random.normal(
        kw, (d_model, c_in, 3), dtype=jnp.float32)

    out = data_embedding(x, x_mark, w_conv)
    out = jax.block_until_ready(out)
    assert out.shape == (B, S, d_model) and out.dtype == jnp.float32

    # ---- independent float64 numpy reference ----
    xn = np.asarray(x, dtype=np.float64)
    wn = np.asarray(w_conv, dtype=np.float64)
    mn = np.asarray(x_mark)
    idx = (np.arange(S)[:, None] + np.arange(3)[None, :] - 1) % S              # (S, 3)
    ref_token = np.einsum('bskc,dck->bsd', xn[:, idx, :], wn)                  # circular conv
    tabs64 = [np.asarray(_sinusoidal_table(nr, d_model), dtype=np.float64)
              for nr in VOCAB_SIZES]
    ref_temporal = sum(tabs64[k][mn[..., k]] for k in range(len(VOCAB_SIZES)))
    ref_pe = np.asarray(_sinusoidal_table(S, d_model), dtype=np.float64)[None]
    ref = ref_token + ref_temporal + ref_pe

    # tolerance covers worst-case bf16-pass MXU rounding; real bugs would be O(1) off
    np.testing.assert_allclose(np.asarray(out), ref, rtol=0.0, atol=3e-2)

    print("KERNEL_OK")
</pallas_src>

<mosaic_0001>
module attributes {stable_mosaic.version = 11 : i64} {
  func.func @_data_embedding_kernel(%arg0: i32, %arg1: i32, %arg2: memref<1x8x16xf32, #tpu.memory_space<vmem>>, %arg3: memref<1x8x4xi32, #tpu.memory_space<vmem>>, %arg4: memref<8x128xf32, #tpu.memory_space<vmem>>, %arg5: memref<16x128xf32, #tpu.memory_space<vmem>>, %arg6: memref<128x128xf32, #tpu.memory_space<vmem>>, %arg7: memref<1x8x128xf32, #tpu.memory_space<vmem>>) attributes {dimension_semantics = [#tpu.dimension_semantics<parallel>, #tpu.dimension_semantics<parallel>], iteration_bounds = array<i64: 1, 2>, scalar_prefetch = 0 : i64, scratch_operands = 0 : i64, tpu.core_type = #tpu.core_type<tc>, window_params = [{transform_indices = @transform_0, window_bounds = array<i64: 1, 8, 16>}, {transform_indices = @transform_1, window_bounds = array<i64: 1, 8, 4>}, {transform_indices = @transform_2, window_bounds = array<i64: 8, 128>}, {pipeline_mode = #tpu.pipeline_mode<synchronous>, transform_indices = @transform_3, window_bounds = array<i64: 16, 128>}, {pipeline_mode = #tpu.pipeline_mode<synchronous>, transform_indices = @transform_4, window_bounds = array<i64: 128, 128>}, {transform_indices = @transform_5, window_bounds = array<i64: 1, 8, 128>}]} {
    %c0 = arith.constant 0 : index
    %c0_0 = arith.constant 0 : index
    %c0_1 = arith.constant 0 : index
    %0 = vector.load %arg2[%c0, %c0_0, %c0_1] : memref<1x8x16xf32, #tpu.memory_space<vmem>>, vector<1x8x16xf32>
    %1 = vector.shape_cast %0 : vector<1x8x16xf32> to vector<8x16xf32>
    %c0_2 = arith.constant 0 : index
    %c0_3 = arith.constant 0 : index
    %2 = vector.load %arg5[%c0_2, %c0_3] : memref<16x128xf32, #tpu.memory_space<vmem>>, vector<16x128xf32>
    %cst = arith.constant dense<0.000000e+00> : vector<8x128xf32>
    %3 = tpu.matmul %1, %2, %cst {dimension_numbers = #tpu.dot_dimension_numbers<[1], [0], [0], [1], [0, 0, 1, 1], [], []>} : vector<8x16xf32>, vector<16x128xf32>, vector<8x128xf32> -> vector<8x128xf32>
    %c0_4 = arith.constant 0 : index
    %c0_5 = arith.constant 0 : index
    %c0_6 = arith.constant 0 : index
    %4 = vector.load %arg3[%c0_4, %c0_5, %c0_6] : memref<1x8x4xi32, #tpu.memory_space<vmem>>, vector<1x8x4xi32>
    %5 = vector.shape_cast %4 : vector<1x8x4xi32> to vector<8x4xi32>
    %6 = tpu.iota {dimensions = array<i32: 1>} : vector<8x128xi32>
    %c0_i32 = arith.constant 0 : i32
    %7 = vector.broadcast %c0_i32 : i32 to vector<8x128xi32>
    %8 = vector.extract_strided_slice %5 {offsets = [0, 0], sizes = [8, 1], strides = [1, 1]} : vector<8x4xi32> to vector<8x1xi32>
    %c0_i32_7 = arith.constant 0 : i32
    %9 = vector.broadcast %c0_i32_7 : i32 to vector<8x1xi32>
    %10 = arith.addi %8, %9 : vector<8x1xi32>
    %11 = vector.broadcast %10 : vector<8x1xi32> to vector<8x128xi32>
    %12 = arith.cmpi eq, %6, %11 : vector<8x128xi32>
    %13 = arith.extui %12 : vector<8x128xi1> to vector<8x128xi32>
    %14 = arith.addi %7, %13 : vector<8x128xi32>
    %15 = vector.extract_strided_slice %5 {offsets = [0, 1], sizes = [8, 1], strides = [1, 1]} : vector<8x4xi32> to vector<8x1xi32>
    %c13_i32 = arith.constant 13 : i32
    %16 = vector.broadcast %c13_i32 : i32 to vector<8x1xi32>
    %17 = arith.addi %15, %16 : vector<8x1xi32>
    %18 = vector.broadcast %17 : vector<8x1xi32> to vector<8x128xi32>
    %19 = arith.cmpi eq, %6, %18 : vector<8x128xi32>
    %20 = arith.extui %19 : vector<8x128xi1> to vector<8x128xi32>
    %21 = arith.addi %14, %20 : vector<8x128xi32>
    %22 = vector.extract_strided_slice %5 {offsets = [0, 2], sizes = [8, 1], strides = [1, 1]} : vector<8x4xi32> to vector<8x1xi32>
    %c45_i32 = arith.constant 45 : i32
    %23 = vector.broadcast %c45_i32 : i32 to vector<8x1xi32>
    %24 = arith.addi %22, %23 : vector<8x1xi32>
    %25 = vector.broadcast %24 : vector<8x1xi32> to vector<8x128xi32>
    %26 = arith.cmpi eq, %6, %25 : vector<8x128xi32>
    %27 = arith.extui %26 : vector<8x128xi1> to vector<8x128xi32>
    %28 = arith.addi %21, %27 : vector<8x128xi32>
    %29 = vector.extract_strided_slice %5 {offsets = [0, 3], sizes = [8, 1], strides = [1, 1]} : vector<8x4xi32> to vector<8x1xi32>
    %c52_i32 = arith.constant 52 : i32
    %30 = vector.broadcast %c52_i32 : i32 to vector<8x1xi32>
    %31 = arith.addi %29, %30 : vector<8x1xi32>
    %32 = vector.broadcast %31 : vector<8x1xi32> to vector<8x128xi32>
    %33 = arith.cmpi eq, %6, %32 : vector<8x128xi32>
    %34 = arith.extui %33 : vector<8x128xi1> to vector<8x128xi32>
    %35 = arith.addi %28, %34 : vector<8x128xi32>
    %36 = arith.sitofp %35 : vector<8x128xi32> to vector<8x128xf32>
    %c0_8 = arith.constant 0 : index
    %c0_9 = arith.constant 0 : index
    %37 = vector.load %arg6[%c0_8, %c0_9] : memref<128x128xf32, #tpu.memory_space<vmem>>, vector<128x128xf32>
    %cst_10 = arith.constant dense<0.000000e+00> : vector<8x128xf32>
    %38 = tpu.matmul %36, %37, %cst_10 {dimension_numbers = #tpu.dot_dimension_numbers<[1], [0], [0], [1], [0, 0, 1, 1], [], []>} : vector<8x128xf32>, vector<128x128xf32>, vector<8x128xf32> -> vector<8x128xf32>
    %39 = arith.addf %3, %38 : vector<8x128xf32>
    %c0_11 = arith.constant 0 : index
    %c0_12 = arith.constant 0 : index
    %40 = vector.load %arg4[%c0_11, %c0_12] : memref<8x128xf32, #tpu.memory_space<vmem>>, vector<8x128xf32>
    %41 = arith.addf %39, %40 : vector<8x128xf32>
    %c0_13 = arith.constant 0 : index
    %c0_14 = arith.constant 0 : index
    %c0_15 = arith.constant 0 : index
    %42 = vector.load %arg7[%c0_13, %c0_14, %c0_15] : memref<1x8x128xf32, #tpu.memory_space<vmem>>, vector<1x8x128xf32>
    %43 = vector.shape_cast %42 : vector<1x8x128xf32> to vector<8x128xf32>
    %44 = vector.shape_cast %41 : vector<8x128xf32> to vector<1x8x128xf32>
    tpu.vector_store %arg7[%c0_13, %c0_14, %c0_15], %44 {strides = array<i32>} : memref<1x8x128xf32, #tpu.memory_space<vmem>>, vector<1x8x128xf32>,
    return
  }
  func.func @transform_0(%arg0: i32, %arg1: i32) -> (i32, i32, i32) {
    %c0_i32 = arith.constant 0 : i32
    %c0_i32_0 = arith.constant 0 : i32
    return %arg1, %arg0, %c0_i32 : i32, i32, i32
  }
  func.func @transform_1(%arg0: i32, %arg1: i32) -> (i32, i32, i32) {
    %c0_i32 = arith.constant 0 : i32
    %c0_i32_0 = arith.constant 0 : i32
    return %arg1, %arg0, %c0_i32 : i32, i32, i32
  }
  func.func @transform_2(%arg0: i32, %arg1: i32) -> (i32, i32) {
    %c0_i32 = arith.constant 0 : i32
    %c0_i32_0 = arith.constant 0 : i32
    return %arg0, %c0_i32 : i32, i32
  }
  func.func @transform_3(%arg0: i32, %arg1: i32) -> (i32, i32) {
    %c0_i32 = arith.constant 0 : i32
    %c0_i32_0 = arith.constant 0 : i32
    %c0_i32_1 = arith.constant 0 : i32
    return %c0_i32, %c0_i32_0 : i32, i32
  }
  func.func @transform_4(%arg0: i32, %arg1: i32) -> (i32, i32) {
    %c0_i32 = arith.constant 0 : i32
    %c0_i32_0 = arith.constant 0 : i32
    %c0_i32_1 = arith.constant 0 : i32
    return %c0_i32, %c0_i32_0 : i32, i32
  }
  func.func @transform_5(%arg0: i32, %arg1: i32) -> (i32, i32, i32) {
    %c0_i32 = arith.constant 0 : i32
    %c0_i32_0 = arith.constant 0 : i32
    return %arg1, %arg0, %c0_i32 : i32, i32, i32
  }
}

</mosaic_0001>

<bundles_post_ra>
// kernel: tpu_custom_call.1
= control target key start
LH: loop header
LB: loop body
LE: loop exit
PB: predicated region body
PF: predicated region fallthrough
CT: control target
= control target key end

     0   :  { %10 = vsyncpa [#allocation3], 0  ;;  %s1183_s0 = inlined_call_operand.vmem [shape: f32[2,8,16], index: 0, kind: input, shape index: {}]   ;;  %s1184_s1 = inlined_call_operand.vmem [shape: s32[2,8,4], index: 1, kind: input, shape index: {}]   ;;  %s1185_s2 = inlined_call_operand.vmem [shape: f32[8,128], index: 2, kind: input, shape index: {}]   ;;  %s1186_s3 = inlined_call_operand.hbm [shape: f32[16,128], index: 3, kind: input, shape index: {}]   ;;  %s1187_s4 = inlined_call_operand.hbm [shape: f32[128,128], index: 4, kind: input, shape index: {}]   ;;  %s1188_s5 = inlined_call_operand.hbm [shape: f32[2,8,128], index: 5, kind: output, shape index: {}]  }
   0x1   :  { %11 = vsyncpa [#allocation6], 0 }
   0x2   :  { %12 = vsyncpa [#allocation4], 0 }
   0x3   :  { %14 = vsyncpa [#allocation4 + $0x1], 0  ;;  %s1002_s18 = smov 0   ;;  %s1004_s19 = smov 0  }
   0x4   :  { %s1006_s20 = smov 0   ;;  %s1008_s21 = smov 0  }
   0x5   :  { %s1010_s22 = smov 0   ;;  %s1012_s23 = smov 0  }
   0x6 LB: > { %s654_s24 = sadd.s32 4294967295, %s959_s23   ;;  %s655_s25 = sadd.s32 4294967294, %s959_s23   ;;  %s959_s23 = sphi %s1012_s23, %s20_s23   ;;  %s955_s22 = sphi %s1010_s22, %s1201_s22   ;;  %s951_s21 = sphi %s1008_s21, %s1200_s21   ;;  %s947_s20 = sphi %s1006_s20, %s1199_s20   ;;  %s943_s19 = sphi %s1004_s19, %s1198_s19   ;;  %s939_s18 = sphi %s1002_s18, %s1197_s18  }
   0x7   : > { %s29_s26 = sadd.s32 1, %s955_s22  ;;  %s165_s27 = sadd.s32 1, %s947_s20 }
   0x8   : > { %p30_p0 = scmp.ge.s32.totalorder %s29_s26, 2  ;;  %p175_p1 = scmp.ne.s32.totalorder %s947_s20, %s943_s19 }
   0x9   : > { %p176_p2 = scmp.eq.s32.totalorder %s654_s24, 1  ;;  %p181_p3 = scmp.ne.s32.totalorder %s943_s19, %s939_s18 }
   0xa   : > { %s1203_s26 = smov (%p30_p0, %s29_s26), 0  ;;  %p182_p5 = scmp.eq.s32.totalorder %s655_s25, 1 }
   0xb   : > { %p1042_p4 = por %p176_p2, %p175_p1  ;;  %s160_s29 = ssub.s32 %s955_s22, %s1203_s26 }
   0xc   : > { %p656_p6 = scmp.ge.s32.totalorder %s959_s23, 1  ;;  %p163_p7 = scmp.eq.s32.totalorder %s160_s29, 0 }
   0xd   : > { %s1190_s28 = scalar_select %p1042_p4, 1, 0 }
   0xe   : > { %p1049_p8 = por %p182_p5, %p181_p3  ;;  %p189_p9 = scmp.lt.s32.totalorder %s959_s23, 3 }
   0xf   : > { %s1055_s6 = scalar_select %p163_p7, %s947_s20, %s165_s27  }
  0x10   : > { %s1191_s30 = scalar_select %p1049_p8, 1, 0 }
  0x11   : > { %p1057_p10 = pnand %p656_p6, %p189_p9  ;;  %p1061_p11 = scmp.eq.s32.totalorder %s654_s24, 0 }
  0x12   : > { %s961_s9 = smov [#allocation2]   ;;  %s962_s12 = smov [#allocation5]  }
  0x13   : > { %p744_p12 = pneg %p1057_p10  ;;  %s208_s10 = sshll.u32 %s961_s9, 4  ;;  %s209_s10 = int_to_ptr.vmem [resolvable:$true] %s208_s10 }
  0x14   : > { %s221_s13 = sshll.u32 %s962_s12, 4  ;;  %s834_s14 = scalar_lea.vmem %s209_s10, 256  ;;  %s222_s13 = int_to_ptr.vmem [resolvable:$true] %s221_s13 }
  0x15   : > { %p1069_p13 = pnand %p1061_p11, %p744_p12  ;;  %p835_p1 = scmp.ne.s32.totalorder %s209_s10, %s834_s14 }
  0x16   : > { %p842_p5 = scmp.lt.s32.totalorder %s209_s10, %s209_s10  ;;  %p843_p6 = scmp.lt.s32.totalorder %s834_s14, %s834_s14 }
  0x17   : > { %p825_p0 = pneg %p1069_p13 }
  0x18   : > { %p844_p7 = por %p843_p6, %p842_p5 }
  0x19   : > { %p837_p2 = pnand %p835_p1, %p825_p0 }
  0x1b   : > { %p838_p3 = pneg %p837_p2 }
  0x1d   : > { %p845_p9 = pnand %p844_p7, %p838_p3 }
  0x1f   : > { %848 = shalt.err (!%p845_p9)
}
  0x20   : > { %s963_s15 = smov 128   ;;  %s964_s16 = smov 8  }
  0x21   : > { %747 = dma.hbm_to_vmem [thread:$0]  (!%p1069_p13), %s1186_s3, 256, %s209_s10, [#allocation3], %s963_s15, %s963_s15, %s964_s16  }
  0x22   : > { %s860_s25 = scalar_lea.vmem %s222_s13, 2048  ;;  %p868_p8 = scmp.lt.s32.totalorder %s222_s13, %s222_s13 }
  0x23   : > { %p861_p12 = scmp.ne.s32.totalorder %s222_s13, %s860_s25  ;;  %p869_p4 = scmp.lt.s32.totalorder %s860_s25, %s860_s25 }
  0x25   : > { %p863_p1 = pnand %p861_p12, %p825_p0  ;;  %p870_p5 = por %p869_p4, %p868_p8 }
  0x27   : > { %p864_p2 = pneg %p863_p1 }
  0x29   : > { %p871_p3 = pnand %p870_p5, %p864_p2 }
  0x2b   : > { %874 = shalt.err (!%p871_p3)
}
  0x2c   : > { %750 = dma.hbm_to_vmem [thread:$0]  (!%p1069_p13), %s1187_s4, 2048, %s222_s13, [#allocation6], %s963_s15, %s963_s15, %s964_s16  }
  0x2d   : > { %257 = sbr.rel (%p1057_p10) target bundleno = 409 (0x199), region = 40 }
  0x32   : > { %926 = dma.done.wait (%p1061_p11), [#allocation3], 256  }
  0x33   : > { %928 = vsyncadd (%p1061_p11), [#allocation3], 4294967040 }
  0x34   : > { %930 = dma.done.wait (%p1061_p11), [#allocation6], 2048  }
  0x35   : > { %932 = vsyncadd (%p1061_p11), [#allocation6], 4294965248  ;;  %p302_p4 = scmp.lt.s32.totalorder %s951_s21, 1  ;;  %v965_v0 = vmov 0   ;;  %v966_v1 = vmov 2   ;;  %v967_v2 = vmov 0.0   ;;  %v324_v28 = vlaneseq }
  0x36   : > { %818 = vset.pattern.permute.xlu0 %v965_v0  ;;  %820 = vset.pattern.permute.xlu1 %v966_v1  ;;  %v368_v4 = vld [vmem:[#allocation5 + $0x78] sm:$0xff]  ;;  %v367_v5 = vld [vmem:[#allocation5 + $0x70] sm:$0xff]  ;;  %v366_v8 = vld [vmem:[#allocation5 + $0x68] sm:$0xff]  ;;  %v968_v11 = vmov 1   ;;  %v969_v14 = vmov 3   ;;  %vm439_vm0 = vcmask 130048  }
  0x37   : > { %s1104_s7 = scalar_select %p302_p4, %s951_s21, 1  ;;  %692 = vmatprep.subr.mxu0 %v967_v2  ;;  %727 = vmatprep.subr.mxu1 %v967_v2  ;;  %v365_v10 = vld [vmem:[#allocation5 + $0x60] sm:$0xff]  ;;  %v364_v12 = vld [vmem:[#allocation5 + $0x58] sm:$0xff]  ;;  %v363_v15 = vld [vmem:[#allocation5 + $0x50] sm:$0xff]  ;;  %vm970_vm1 = vmmov 0   ;;  %v325_v29 = vand.u32 127, %v324_v28 }
  0x38   : > { %693 = vmatpush3.msra.mxu0 %v368_v4  ;;  %v322_v13 = vld [vmem:[#allocation2 + $0x8] sm:$0xff]  ;;  %v321_v16 = vld [vmem:[#allocation2] sm:$0xff]  ;;  %v362_v17 = vld [vmem:[#allocation5 + $0x48] sm:$0xff]  ;;  %731 = vmatprep.mubr.msk.f32.mxu1 %vm970_vm1, %v967_v2  ;;  %s299_s15 = sand.u32 1, %s943_s19   ;;  %s669_s25 = sshll.u32 %s951_s21, 7 }
  0x39   : > { %s665_s9 = sshll.u32 %s1104_s7, 3  ;;  %694 = vmatprep.subr.mxu0 %v967_v2  ;;  %728 = vmatpush3.msra.mxu1 %v322_v13  ;;  %v361_v19 = vld [vmem:[#allocation5 + $0x40] sm:$0xff]  ;;  %v360_v20 = vld [vmem:[#allocation5 + $0x38] sm:$0xff]  ;;  %v359_v21 = vld [vmem:[#allocation5 + $0x30] sm:$0xff]  ;;  %s664_s16 = sshll.u32 %s299_s15, 3 }
  0x3a   : > { %s315_s11 = scalar_lea.vmem %s1184_s1, %s665_s9  ;;  %695 = vmatpush3.msra.mxu0 %v367_v5  ;;  %s308_s14 = scalar_lea.vmem %s1183_s0, %s665_s9  ;;  %729 = vmatprep.subr.mxu1 %v967_v2  ;;  %v358_v22 = vld [vmem:[#allocation5 + $0x28] sm:$0xff]  ;;  %v357_v23 = vld [vmem:[#allocation5 + $0x20] sm:$0xff]  ;;  %v356_v24 = vld [vmem:[#allocation5 + $0x18] sm:$0xff] }
  0x3b   : > { %v323_v3 = vld [vmem:[%s315_s11] sm:$0xff]  ;;  %696 = vmatprep.subr.mxu0 %v967_v2  ;;  %730 = vmatpush3.msra.mxu1 %v321_v16  ;;  %v354_v26 = vld [vmem:[#allocation5 + $0x8] sm:$0xff]  ;;  %v353_v27 = vld [vmem:[#allocation5] sm:$0xff]  ;;  %s301_s27 = scalar_lea.vmem [#allocation7], %s664_s16  ;;  %s529_s8 = scalar_lea.hbm %s1188_s5, %s669_s25 }
  0x3c   : > { %327 = vperm.xlu0 %818, %v323_v3   ;;  %v338_v6 = vadd.s32 45, %v323_v3  ;;  %v331_v7 = vadd.s32 13, %v323_v3  ;;  %v345_v9 = vadd.s32 52, %v323_v3  ;;  %697 = vmatpush3.msra.mxu0 %v366_v8  ;;  %v320_v18 = vld [vmem:[%s308_s14] sm:$0xff]  ;;  %s531_s29 = sshll.u32 %s301_s27, 4  ;;  %s517_s10 = scalar_lea.sflag [#allocation4], %s299_s15  ;;  %s532_s29 = int_to_ptr.vmem [resolvable:$true] %s531_s29 }
  0x3d   : > { %698 = vmatprep.subr.mxu0 %v967_v2  ;;  %732 = vmatmul.mubr.msk.f32.vlgmr.msra.gmra.mxu1 %vm439_vm0, %v320_v18  ;;  %v355_v25 = vld [vmem:[#allocation5 + $0x10] sm:$0xff]  ;;  %s875_s11 = scalar_lea.vmem %s532_s29, 128  ;;  %p1195_p10 = scmp.ne.s32.totalorder %s1190_s28, 0 }
  0x3e   : > { %340 = vperm.xlu1 %820, %v338_v6   ;;  %699 = vmatpush3.msra.mxu0 %v365_v10  ;;  %v513_v45 = vld [vmem:[%s1185_s2] sm:$0xff]  ;;  %p876_p8 = scmp.ne.s32.totalorder %s532_s29, %s875_s11  ;;  %s971_s12 = smov [#allocation7]  }
  0x3f   : > { %700 = vmatprep.subr.mxu0 %v967_v2  ;;  %724 = vmatprep.mubr.msk.f32.mxu0 %vm970_vm1, %v967_v2  ;;  %s879_s13 = sshll.u32 %s971_s12, 4  ;;  %s880_s13 = int_to_ptr.vmem [resolvable:$false] %s879_s13 }
  0x40   : > { %819 = vset.pattern.permute.xlu0 %v968_v11  ;;  %701 = vmatpush3.msra.mxu0 %v364_v12  ;;  %p877_p11 = pnand %p876_p8, %p1195_p10  ;;  %s881_s21 = scalar_lea.vmem %s880_s13, 256 }
  0x41   : > { %333 = vperm.xlu0 %819, %v331_v7   ;;  %702 = vmatprep.subr.mxu0 %v967_v2  ;;  %p882_p0 = scmp.lt.s32.totalorder %s532_s29, %s880_s13  ;;  %p883_p6 = scmp.lt.s32.totalorder %s881_s21, %s875_s11 }
  0x42   : > { %821 = vset.pattern.permute.xlu1 %v969_v14  ;;  %703 = vmatpush3.msra.mxu0 %v363_v15  ;;  %p878_p13 = pneg %p877_p11 }
  0x43   : > { %347 = vperm.xlu1 %821, %v345_v9   ;;  %704 = vmatprep.subr.mxu0 %v967_v2  ;;  %p884_p7 = por %p883_p6, %p882_p0 }
  0x44   : > { %705 = vmatpush3.msra.mxu0 %v362_v17 }
  0x45   : > { %706 = vmatprep.subr.mxu0 %v967_v2  ;;  %822 = vset.pattern.permute.xlu0 %v969_v14  ;;  %p885_p9 = pnand %p884_p7, %p878_p13 }
  0x46   : > { %707 = vmatpush3.msra.mxu0 %v361_v19 }
  0x47   : > { %708 = vmatprep.subr.mxu0 %v967_v2 }
  0x48   : > { %709 = vmatpush3.msra.mxu0 %v360_v20 }
  0x49   : > { %710 = vmatprep.subr.mxu0 %v967_v2 }
  0x4a   : > { %711 = vmatpush3.msra.mxu0 %v359_v21 }
  0x4b   : > { %712 = vmatprep.subr.mxu0 %v967_v2 }
  0x4c   : > { %713 = vmatpush3.msra.mxu0 %v358_v22 }
  0x4d   : > { %714 = vmatprep.subr.mxu0 %v967_v2 }
  0x4e   : > { %715 = vmatpush3.msra.mxu0 %v357_v23 }
  0x4f   : > { %716 = vmatprep.subr.mxu0 %v967_v2 }
  0x50   : > { %717 = vmatpush3.msra.mxu0 %v356_v24 }
  0x51   : > { %718 = vmatprep.subr.mxu0 %v967_v2 }
  0x52   : > { %719 = vmatpush3.msra.mxu0 %v355_v25 }
  0x53   : > { %720 = vmatprep.subr.mxu0 %v967_v2 }
  0x54   : > { %721 = vmatpush3.msra.mxu0 %v354_v26 }
  0x55   : > { %722 = vmatprep.subr.mxu0 %v967_v2 }
  0x56   : > { %723 = vmatpush3.msra.mxu0 %v353_v27 }
  0xb7   : > { %v328_v30 = vpop.permute.xlu0 %327 }
  0xb8   : > { %vm329_vm2 = vcmp.eq.s32.totalorder %v325_v29, %v328_v30 }
  0xb9   : > { %v341_v31 = vpop.permute.xlu1 %340  ;;  %v330_v33 = vsel %vm329_vm2, 1, %v965_v0 }
  0xba   : > { %vm342_vm3 = vcmp.eq.s32.totalorder %v325_v29, %v341_v31 }
  0xbb   : > { %v343_v37 = vsel %vm342_vm3, 1, %v965_v0 }
  0xbc   : > { %v334_v32 = vpop.permute.xlu0 %333 }
  0xbd   : > { %vm335_vm4 = vcmp.eq.s32.totalorder %v325_v29, %v334_v32 }
  0xbe   : > { %v336_v34 = vsel %vm335_vm4, 1, %v965_v0  ;;  %v348_v35 = vpop.permute.xlu1 %347 }
  0xbf   : > { %v337_v36 = vadd.s32 %v336_v34, %v330_v33  ;;  %vm349_vm5 = vcmp.eq.s32.totalorder %v325_v29, %v348_v35 }
  0xc0   : > { %v350_v38 = vsel %vm349_vm5, 1, %v965_v0 }
  0xc1   : > { %v344_v39 = vadd.s32 %v343_v37, %v337_v36 }
  0xc3   : > { %v351_v40 = vadd.s32 %v350_v38, %v344_v39 }
  0xc5   : > { %v352_v41 = vcvt.s32.f32 %v351_v40 }
  0xc7   : > { %725 = vmatmul.mubr.f32.vlgmr.msra.gmra.mxu0 %v352_v41 }
  0xfd   : > { %v509_v42 = vpop.f32.mrf.mxu1 }
  0xff   : > { %v733_v43 = vpop.f32.mrf.mxu1 }
 0x187   : > { %v435_v44 = vpop.f32.mrf.mxu0 }
 0x188   : > { %v510_v46 = vadd.f32 %v509_v42, %v435_v44 }
 0x189   : > { %v726_v47 = vpop.f32.mrf.mxu0 }
 0x18a   : > { %v514_v48 = vadd.f32 %v513_v45, %v510_v46 }
 0x18c   : > { %515 = vst [vmem:[%s301_s27] sm:$0xff] %v514_v48 }
 0x18d   : > { %888 = shalt.err (!%p885_p9)
}
 0x18e   : > { %s889_s14 = scalar_lea.hbm %s529_s8, 128  ;;  %s893_s17 = scalar_lea.hbm %s1188_s5, 256 }
 0x18f   : > { %p890_p12 = scmp.ne.s32.totalorder %s529_s8, %s889_s14  ;;  %p894_p5 = scmp.lt.s32.totalorder %s529_s8, %s1188_s5 }
 0x190   : > { %p895_p3 = scmp.lt.s32.totalorder %s893_s17, %s889_s14 }
 0x191   : > { %p891_p1 = pnand %p890_p12, %p1195_p10 }
 0x192   : > { %p896_p4 = por %p895_p3, %p894_p5 }
 0x193   : > { %p892_p2 = pneg %p891_p1 }
 0x195   : > { %p897_p8 = pnand %p896_p4, %p892_p2 }
 0x197   : > { %900 = shalt.err (!%p897_p8)
}
 0x198   : > { %742 = dma.vmem_to_hbm [thread:$0]  (%p1195_p10), %s532_s29, 128, %s529_s8, %s517_s10  }
 0x199 PF: > { %p759_p11 = scmp.ge.s32.totalorder %s959_s23, 2  ;;  %s543_s27 = sand.u32 1, %s939_s18  }
 0x19a   : > { %p1196_p13 = scmp.ne.s32.totalorder %s1191_s30, 0  ;;  %s544_s7 = scalar_lea.sflag [#allocation4], %s543_s27 }
 0x19c   : > { %p752_p0 = pnand %p759_p11, %p1196_p13 }
 0x19e   : > { %p753_p6 = pneg %p752_p0 }
 0x1a0   : > { %934 = dma.done.wait (%p753_p6), %s544_s7, 128  }
 0x1a1   : > { %936 = vsyncadd (%p753_p6), %s544_s7, 4294967168  ;;  %s20_s23 = sadd.s32 1, %s959_s23   ;;  %s1197_s18 = smov %s943_s19 }
 0x1a2   : > { %p17_p7 = scmp.ge.s32.totalorder %s20_s23, 4   ;;  %s1198_s19 = smov %s947_s20 }
 0x1a3   : > { %s1199_s20 = smov %s1055_s6  ;;  %s1200_s21 = smov %s955_s22 }
 0x1a4   : > { %s1201_s22 = smov %s1203_s26  ;;  %19 = sbr.rel (!%p17_p7) target bundleno = 6 (0x6), region = 90 }
 0x1a9   :  { %549 = vsyncpa [#allocation3], 1 }
 0x1aa   :  { %551 = vsyncpa [#allocation3 + $0x1], 1 }
 0x1ab   :  { %552 = vsyncpa [#allocation6], 1 }
 0x1ac   :  { %553 = vsyncpa [#allocation4], 1 }
 0x1ad   :  { %555 = vsyncpa [#allocation4 + $0x1], 1 }

</bundles_post_ra>
